<compile_context>
chip_gen: v6e
topology: v6e:2x2x1
jax: 0.10.0
libtpu: 0.0.40
codegen_flags: <defaults>
</compile_context>

<pallas_src>
import jax
import jax.numpy as jnp
import numpy as np
from jax import lax
from jax.experimental import pallas as pl
from jax.experimental.pallas import tpu as pltpu


def _tile_plan(B, C, HW, itemsize, target_block_bytes):
    """Pick (b_tile, hw_tile) so one x block stays <= target_block_bytes."""
    if C * HW * itemsize <= target_block_bytes:
        hw_tile = HW                                    # full spatial extent
    else:
        hw_tile = max(128, (target_block_bytes // (C * itemsize)) // 128 * 128)
    b_tile = int(max(1, min(B, target_block_bytes // (C * hw_tile * itemsize))))
    return b_tile, int(hw_tile)


def channel_attention(x, w1_fc, w2_fc, w1_conv, w2_conv, a_fc, a_conv,
                      *, target_block_bytes=4 * 1024 * 1024):
    """x: (B, C, H, W). Weights use PyTorch conventions:
       w1_fc   (Hd, C)        Linear(C, Hd, bias=False)
       w2_fc   (C, Hd)        Linear(Hd, C, bias=False)
       w1_conv (Hd, C, 1, 1)  Conv2d(C, Hd, 1, bias=False)
       w2_conv (C, Hd, 1, 1)  Conv2d(Hd, C, 1, bias=False)
       a_fc, a_conv: (1,) PReLU slopes.
       Returns (B, C, 1, 1) float32."""
    B, C, H, W = x.shape
    Hd = w1_fc.shape[0]
    HW = H * W
    x_flat = x.reshape(B, C, HW)
    itemsize = jnp.dtype(x.dtype).itemsize

    b_tile, hw_tile = _tile_plan(B, C, HW, itemsize, target_block_bytes)
    nb = pl.cdiv(B, b_tile)
    ns = pl.cdiv(HW, hw_tile)
    needs_mask = (HW % hw_tile) != 0
    inv_hw = 1.0 / HW

    f32 = jnp.float32
    # Fused first-layer weight: cols [0:Hd] = Linear path, [Hd:2Hd] = conv path.
    w1c = w1_conv.reshape(Hd, C)
    w2c = w2_conv.reshape(C, Hd)
    w1_fused = jnp.concatenate([w1_fc.T, w1c.T], axis=1).astype(f32)        # (C, 2Hd)
    zeros_hd = jnp.zeros((Hd, C), f32)
    w2_fc_pad = jnp.concatenate([w2_fc.T.astype(f32), zeros_hd], axis=0)    # (2Hd, C)
    w2_cv_pad = jnp.concatenate([zeros_hd, w2c.T.astype(f32)], axis=0)      # (2Hd, C)
    slope_row = jnp.concatenate(
        [jnp.broadcast_to(a_fc.astype(f32), (Hd,)),
         jnp.broadcast_to(a_conv.astype(f32), (Hd,))]).reshape(1, 2 * Hd)   # (1, 2Hd)

    def kernel(x_ref, w1_ref, w2fc_ref, w2cv_ref, slope_ref, o_ref,
               sum_acc, max_acc):
        s = pl.program_id(1)

        @pl.when(s == 0)
        def _init():
            sum_acc[...] = jnp.zeros_like(sum_acc)
            max_acc[...] = jnp.full_like(max_acc, -jnp.inf)

        tile = x_ref[...].astype(jnp.float32)           # (b_tile, C, hw_tile)
        if needs_mask:
            lane = lax.broadcasted_iota(jnp.int32, tile.shape, 2)
            valid = HW - s * hw_tile                    # == hw_tile except last step
            keep = lane < valid
            tile_s = jnp.where(keep, tile, 0.0)
            tile_m = jnp.where(keep, tile, -jnp.inf)
        else:
            tile_s = tile
            tile_m = tile

        # Streaming pooled reductions (pre-scaled sum -> running mean).
        sum_acc[...] = sum_acc[...] + jnp.sum(tile_s, axis=-1) * inv_hw
        max_acc[...] = jnp.maximum(max_acc[...], jnp.max(tile_m, axis=-1))

        @pl.when(s == pl.num_programs(1) - 1)
        def _finalize():
            avg = sum_acc[...]                          # AdaptiveAvgPool2d(1)
            mx = max_acc[...]                           # AdaptiveMaxPool2d(1)
            p = jnp.concatenate([avg, mx], axis=0)      # (2*b_tile, C)
            h = jnp.dot(p, w1_ref[...], preferred_element_type=jnp.float32)
            h = jnp.where(h >= 0, h, h * slope_ref[...])        # per-column PReLU
            fc_out = jax.nn.sigmoid(
                jnp.dot(h, w2fc_ref[...], preferred_element_type=jnp.float32))
            cv_out = jnp.dot(h, w2cv_ref[...], preferred_element_type=jnp.float32)
            o = (fc_out[:b_tile] + fc_out[b_tile:]
                 + cv_out[:b_tile] + cv_out[b_tile:])
            o_ref[0] = jax.nn.sigmoid(o)

    grid_spec = pltpu.PrefetchScalarGridSpec(
        num_scalar_prefetch=0,
        grid=(nb, ns),
        in_specs=[
            pl.BlockSpec((b_tile, C, hw_tile), lambda b, s: (b, 0, s)),
            pl.BlockSpec((C, 2 * Hd), lambda b, s: (0, 0)),
            pl.BlockSpec((2 * Hd, C), lambda b, s: (0, 0)),
            pl.BlockSpec((2 * Hd, C), lambda b, s: (0, 0)),
            pl.BlockSpec((1, 2 * Hd), lambda b, s: (0, 0)),
        ],
        out_specs=pl.BlockSpec((1, b_tile, C), lambda b, s: (b, 0, 0)),
        scratch_shapes=[
            pltpu.VMEM((b_tile, C), jnp.float32),       # running mean
            pltpu.VMEM((b_tile, C), jnp.float32),       # running max
        ],
    )

    cost = pl.CostEstimate(
        flops=int(2 * B * C * HW + 3 * 2 * (2 * B) * C * (2 * Hd)),
        transcendentals=int(3 * B * C),
        bytes_accessed=int(x_flat.size * itemsize
                           + (w1_fused.size + w2_fc_pad.size
                              + w2_cv_pad.size + slope_row.size) * 4
                           + nb * b_tile * C * 4),
    )

    out = pl.pallas_call(
        kernel,
        out_shape=jax.ShapeDtypeStruct((nb, b_tile, C), jnp.float32),
        grid_spec=grid_spec,
        compiler_params=pltpu.CompilerParams(
            dimension_semantics=("parallel", "arbitrary"),
            vmem_limit_bytes=32 * 1024 * 1024,
        ),
        cost_estimate=cost,
    )(x_flat, w1_fused, w2_fc_pad, w2_cv_pad, slope_row)

    out = out.reshape(nb * b_tile, C)[:B]               # drop padded batch rows
    return out.reshape(B, C, 1, 1)


def channel_attention_reference(x, w1_fc, w2_fc, w1_conv, w2_conv, a_fc, a_conv):
    B, C, H, W = x.shape
    Hd = w1_fc.shape[0]
    xf = x.astype(jnp.float32)
    avg = xf.mean(axis=(2, 3))
    mx = xf.max(axis=(2, 3))

    def prelu(v, a):
        return jnp.where(v >= 0, v, a * v)

    def fc_path(p):
        return jax.nn.sigmoid(prelu(p @ w1_fc.T, a_fc[0]) @ w2_fc.T)

    w1c = w1_conv.reshape(Hd, C)
    w2c = w2_conv.reshape(C, Hd)

    def conv_path(p):
        return prelu(p @ w1c.T, a_conv[0]) @ w2c.T

    out = jax.nn.sigmoid(fc_path(avg) + fc_path(mx) + conv_path(avg) + conv_path(mx))
    return out.reshape(B, C, 1, 1)


if __name__ == "__main__":
    def _run_case(B, C, H, W, ratio, key):
        Hd = max(1, C // ratio)
        kx, k1, k2, k3, k4 = jax.random.split(key, 5)
        x = jax.random.normal(kx, (B, C, H, W), dtype=jnp.float32)
        w1_fc = jax.random.normal(k1, (Hd, C), dtype=jnp.float32) * 0.1
        w2_fc = jax.random.normal(k2, (C, Hd), dtype=jnp.float32) * 0.1
        w1_conv = jax.random.normal(k3, (Hd, C, 1, 1), dtype=jnp.float32) * 0.1
        w2_conv = jax.random.normal(k4, (C, Hd, 1, 1), dtype=jnp.float32) * 0.1
        a_fc = jnp.array([0.25], dtype=jnp.float32)    # nn.PReLU() default
        a_conv = jnp.array([0.25], dtype=jnp.float32)  # nn.PReLU() default

        out = jax.block_until_ready(
            channel_attention(x, w1_fc, w2_fc, w1_conv, w2_conv, a_fc, a_conv))
        ref = channel_attention_reference(x, w1_fc, w2_fc, w1_conv, w2_conv,
                                          a_fc, a_conv)
        assert out.shape == (B, C, 1, 1)
        np.testing.assert_allclose(np.asarray(out), np.asarray(ref),
                                   rtol=1e-5, atol=1e-5)

    root = jax.random.PRNGKey(0)
    k1, k2, k3 = jax.random.split(root, 3)
    # Small demo shape (single grid step).
    _run_case(2, 32, 16, 16, 16, k1)
    # Streaming path: multiple spatial tiles + masked remainder spatial tile.
    _run_case(2, 64, 160, 160, 16, k2)
    # Batch-tiled path with a padded (dropped) remainder batch row.
    _run_case(3, 32, 128, 128, 16, k3)

    print("KERNEL_OK")
</pallas_src>

<mosaic_0001>
module attributes {stable_mosaic.version = 11 : i64} {
  func.func @kernel(%arg0: i32, %arg1: i32, %arg2: memref<2x32x256xf32, #tpu.memory_space<vmem>>, %arg3: memref<32x4xf32, #tpu.memory_space<vmem>>, %arg4: memref<4x32xf32, #tpu.memory_space<vmem>>, %arg5: memref<4x32xf32, #tpu.memory_space<vmem>>, %arg6: memref<1x4xf32, #tpu.memory_space<vmem>>, %arg7: memref<1x2x32xf32, #tpu.memory_space<vmem>>, %arg8: memref<2x32xf32, #tpu.memory_space<vmem>>, %arg9: memref<2x32xf32, #tpu.memory_space<vmem>>) attributes {dimension_semantics = [#tpu.dimension_semantics<parallel>, #tpu.dimension_semantics<arbitrary>], iteration_bounds = array<i64: 1, 1>, scalar_prefetch = 0 : i64, scratch_operands = 2 : i64, tpu.core_type = #tpu.core_type<tc>, window_params = [{transform_indices = @transform_0, window_bounds = array<i64: 2, 32, 256>}, {pipeline_mode = #tpu.pipeline_mode<synchronous>, transform_indices = @transform_1, window_bounds = array<i64: 32, 4>}, {pipeline_mode = #tpu.pipeline_mode<synchronous>, transform_indices = @transform_2, window_bounds = array<i64: 4, 32>}, {pipeline_mode = #tpu.pipeline_mode<synchronous>, transform_indices = @transform_3, window_bounds = array<i64: 4, 32>}, {pipeline_mode = #tpu.pipeline_mode<synchronous>, transform_indices = @transform_4, window_bounds = array<i64: 1, 4>}, {transform_indices = @transform_5, window_bounds = array<i64: 1, 2, 32>}]} {
    %c0_i32 = arith.constant 0 : i32
    %0 = arith.cmpi eq, %arg1, %c0_i32 : i32
    %1 = arith.extui %0 : i1 to i32
    %c0_i32_0 = arith.constant 0 : i32
    %2 = arith.cmpi ne, %1, %c0_i32_0 : i32
    scf.if %2 {
      %cst_15 = arith.constant 0.000000e+00 : f32
      %17 = vector.broadcast %cst_15 : f32 to vector<2x32xf32>
      %c0_16 = arith.constant 0 : index
      %c0_17 = arith.constant 0 : index
      %18 = vector.load %arg8[%c0_16, %c0_17] : memref<2x32xf32, #tpu.memory_space<vmem>>, vector<2x32xf32>
      tpu.vector_store %arg8[%c0_16, %c0_17], %17 {strides = array<i32>} : memref<2x32xf32, #tpu.memory_space<vmem>>, vector<2x32xf32>,
      %cst_18 = arith.constant 0xFF800000 : f32
      %19 = vector.broadcast %cst_18 : f32 to vector<2x32xf32>
      %c0_19 = arith.constant 0 : index
      %c0_20 = arith.constant 0 : index
      %20 = vector.load %arg9[%c0_19, %c0_20] : memref<2x32xf32, #tpu.memory_space<vmem>>, vector<2x32xf32>
      tpu.vector_store %arg9[%c0_19, %c0_20], %19 {strides = array<i32>} : memref<2x32xf32, #tpu.memory_space<vmem>>, vector<2x32xf32>,
    } else {
    }
    %c0 = arith.constant 0 : index
    %c0_1 = arith.constant 0 : index
    %c0_2 = arith.constant 0 : index
    %3 = vector.load %arg2[%c0, %c0_1, %c0_2] : memref<2x32x256xf32, #tpu.memory_space<vmem>>, vector<2x32x256xf32>
    %c0_3 = arith.constant 0 : index
    %c0_4 = arith.constant 0 : index
    %4 = vector.load %arg8[%c0_3, %c0_4] : memref<2x32xf32, #tpu.memory_space<vmem>>, vector<2x32xf32>
    %cst = arith.constant dense<0.000000e+00> : vector<2x32xf32>
    %5 = vector.multi_reduction <add>, %3, %cst [2] : vector<2x32x256xf32> to vector<2x32xf32>
    %cst_5 = arith.constant 3.906250e-03 : f32
    %6 = vector.broadcast %cst_5 : f32 to vector<2x32xf32>
    %7 = arith.mulf %5, %6 : vector<2x32xf32>
    %8 = arith.addf %4, %7 : vector<2x32xf32>
    %c0_6 = arith.constant 0 : index
    %c0_7 = arith.constant 0 : index
    %9 = vector.load %arg8[%c0_6, %c0_7] : memref<2x32xf32, #tpu.memory_space<vmem>>, vector<2x32xf32>
    tpu.vector_store %arg8[%c0_6, %c0_7], %8 {strides = array<i32>} : memref<2x32xf32, #tpu.memory_space<vmem>>, vector<2x32xf32>,
    %c0_8 = arith.constant 0 : index
    %c0_9 = arith.constant 0 : index
    %10 = vector.load %arg9[%c0_8, %c0_9] : memref<2x32xf32, #tpu.memory_space<vmem>>, vector<2x32xf32>
    %cst_10 = arith.constant dense<0xFF800000> : vector<2x32xf32>
    %11 = vector.multi_reduction <maximumf>, %3, %cst_10 [2] : vector<2x32x256xf32> to vector<2x32xf32>
    %12 = arith.maximumf %10, %11 : vector<2x32xf32>
    %c0_11 = arith.constant 0 : index
    %c0_12 = arith.constant 0 : index
    %13 = vector.load %arg9[%c0_11, %c0_12] : memref<2x32xf32, #tpu.memory_space<vmem>>, vector<2x32xf32>
    tpu.vector_store %arg9[%c0_11, %c0_12], %12 {strides = array<i32>} : memref<2x32xf32, #tpu.memory_space<vmem>>, vector<2x32xf32>,
    %c0_i32_13 = arith.constant 0 : i32
    %14 = arith.cmpi eq, %arg1, %c0_i32_13 : i32
    %15 = arith.extui %14 : i1 to i32
    %c0_i32_14 = arith.constant 0 : i32
    %16 = arith.cmpi ne, %15, %c0_i32_14 : i32
    scf.if %16 {
      %c0_15 = arith.constant 0 : index
      %c0_16 = arith.constant 0 : index
      %17 = vector.load %arg8[%c0_15, %c0_16] : memref<2x32xf32, #tpu.memory_space<vmem>>, vector<2x32xf32>
      %c0_17 = arith.constant 0 : index
      %c0_18 = arith.constant 0 : index
      %18 = vector.load %arg9[%c0_17, %c0_18] : memref<2x32xf32, #tpu.memory_space<vmem>>, vector<2x32xf32>
      %19 = tpu.concatenate %17, %18 in 0 : vector<2x32xf32>, vector<2x32xf32> -> vector<4x32xf32>
      %c0_19 = arith.constant 0 : index
      %c0_20 = arith.constant 0 : index
      %20 = vector.load %arg3[%c0_19, %c0_20] : memref<32x4xf32, #tpu.memory_space<vmem>>, vector<32x4xf32>
      %cst_21 = arith.constant dense<0.000000e+00> : vector<4x4xf32>
      %21 = tpu.matmul %19, %20, %cst_21 {dimension_numbers = #tpu.dot_dimension_numbers<[1], [0], [0], [1], [0, 0, 1, 1], [], []>} : vector<4x32xf32>, vector<32x4xf32>, vector<4x4xf32> -> vector<4x4xf32>
      %cst_22 = arith.constant 0.000000e+00 : f32
      %22 = vector.broadcast %cst_22 : f32 to vector<4x4xf32>
      %23 = arith.cmpf oge, %21, %22 : vector<4x4xf32>
      %c0_23 = arith.constant 0 : index
      %c0_24 = arith.constant 0 : index
      %24 = vector.load %arg6[%c0_23, %c0_24] : memref<1x4xf32, #tpu.memory_space<vmem>>, vector<1x4xf32>
      %25 = vector.broadcast %24 : vector<1x4xf32> to vector<4x4xf32>
      %26 = arith.mulf %21, %25 : vector<4x4xf32>
      %27 = arith.select %23, %21, %26 : vector<4x4xi1>, vector<4x4xf32>
      %c0_25 = arith.constant 0 : index
      %c0_26 = arith.constant 0 : index
      %28 = vector.load %arg4[%c0_25, %c0_26] : memref<4x32xf32, #tpu.memory_space<vmem>>, vector<4x32xf32>
      %cst_27 = arith.constant dense<0.000000e+00> : vector<4x32xf32>
      %29 = tpu.matmul %27, %28, %cst_27 {dimension_numbers = #tpu.dot_dimension_numbers<[1], [0], [0], [1], [0, 0, 1, 1], [], []>} : vector<4x4xf32>, vector<4x32xf32>, vector<4x32xf32> -> vector<4x32xf32>
      %30 = arith.negf %29 : vector<4x32xf32>
      %31 = math.exp %30 : vector<4x32xf32>
      %cst_28 = arith.constant 1.000000e+00 : f32
      %32 = vector.broadcast %cst_28 : f32 to vector<4x32xf32>
      %33 = arith.addf %32, %31 : vector<4x32xf32>
      %34 = arith.divf %32, %33 : vector<4x32xf32>
      %c0_29 = arith.constant 0 : index
      %c0_30 = arith.constant 0 : index
      %35 = vector.load %arg5[%c0_29, %c0_30] : memref<4x32xf32, #tpu.memory_space<vmem>>, vector<4x32xf32>
      %cst_31 = arith.constant dense<0.000000e+00> : vector<4x32xf32>
      %36 = tpu.matmul %27, %35, %cst_31 {dimension_numbers = #tpu.dot_dimension_numbers<[1], [0], [0], [1], [0, 0, 1, 1], [], []>} : vector<4x4xf32>, vector<4x32xf32>, vector<4x32xf32> -> vector<4x32xf32>
      %37 = vector.extract_strided_slice %34 {offsets = [0, 0], sizes = [2, 32], strides = [1, 1]} : vector<4x32xf32> to vector<2x32xf32>
      %38 = vector.extract_strided_slice %34 {offsets = [2, 0], sizes = [2, 32], strides = [1, 1]} : vector<4x32xf32> to vector<2x32xf32>
      %39 = arith.addf %37, %38 : vector<2x32xf32>
      %40 = vector.extract_strided_slice %36 {offsets = [0, 0], sizes = [2, 32], strides = [1, 1]} : vector<4x32xf32> to vector<2x32xf32>
      %41 = arith.addf %39, %40 : vector<2x32xf32>
      %42 = vector.extract_strided_slice %36 {offsets = [2, 0], sizes = [2, 32], strides = [1, 1]} : vector<4x32xf32> to vector<2x32xf32>
      %43 = arith.addf %41, %42 : vector<2x32xf32>
      %44 = arith.negf %43 : vector<2x32xf32>
      %45 = math.exp %44 : vector<2x32xf32>
      %cst_32 = arith.constant 1.000000e+00 : f32
      %46 = vector.broadcast %cst_32 : f32 to vector<2x32xf32>
      %47 = arith.addf %46, %45 : vector<2x32xf32>
      %48 = arith.divf %46, %47 : vector<2x32xf32>
      %c0_33 = arith.constant 0 : index
      %c0_34 = arith.constant 0 : index
      %c0_35 = arith.constant 0 : index
      %49 = vector.load %arg7[%c0_33, %c0_34, %c0_35] : memref<1x2x32xf32, #tpu.memory_space<vmem>>, vector<1x2x32xf32>
      %50 = vector.shape_cast %49 : vector<1x2x32xf32> to vector<2x32xf32>
      %51 = vector.shape_cast %48 : vector<2x32xf32> to vector<1x2x32xf32>
      tpu.vector_store %arg7[%c0_33, %c0_34, %c0_35], %51 {strides = array<i32>} : memref<1x2x32xf32, #tpu.memory_space<vmem>>, vector<1x2x32xf32>,
    } else {
    }
    return
  }
  func.func @transform_0(%arg0: i32, %arg1: i32) -> (i32, i32, i32) {
    %c0_i32 = arith.constant 0 : i32
    %c0_i32_0 = arith.constant 0 : i32
    return %arg0, %c0_i32, %arg1 : i32, i32, i32
  }
  func.func @transform_1(%arg0: i32, %arg1: i32) -> (i32, i32) {
    %c0_i32 = arith.constant 0 : i32
    %c0_i32_0 = arith.constant 0 : i32
    %c0_i32_1 = arith.constant 0 : i32
    return %c0_i32, %c0_i32_0 : i32, i32
  }
  func.func @transform_2(%arg0: i32, %arg1: i32) -> (i32, i32) {
    %c0_i32 = arith.constant 0 : i32
    %c0_i32_0 = arith.constant 0 : i32
    %c0_i32_1 = arith.constant 0 : i32
    return %c0_i32, %c0_i32_0 : i32, i32
  }
  func.func @transform_3(%arg0: i32, %arg1: i32) -> (i32, i32) {
    %c0_i32 = arith.constant 0 : i32
    %c0_i32_0 = arith.constant 0 : i32
    %c0_i32_1 = arith.constant 0 : i32
    return %c0_i32, %c0_i32_0 : i32, i32
  }
  func.func @transform_4(%arg0: i32, %arg1: i32) -> (i32, i32) {
    %c0_i32 = arith.constant 0 : i32
    %c0_i32_0 = arith.constant 0 : i32
    %c0_i32_1 = arith.constant 0 : i32
    return %c0_i32, %c0_i32_0 : i32, i32
  }
  func.func @transform_5(%arg0: i32, %arg1: i32) -> (i32, i32, i32) {
    %c0_i32 = arith.constant 0 : i32
    %c0_i32_0 = arith.constant 0 : i32
    %c0_i32_1 = arith.constant 0 : i32
    return %arg0, %c0_i32, %c0_i32_0 : i32, i32, i32
  }
}

</mosaic_0001>

<bundles_post_ra>
// kernel: tpu_custom_call.1
= control target key start
LH: loop header
LB: loop body
LE: loop exit
PB: predicated region body
PF: predicated region fallthrough
CT: control target
= control target key end

     0   :  { %10 = vsyncpa [#allocation5], 0  ;;  %s707_s0 = inlined_call_operand.hbm [shape: f32[2,32,256], index: 0, kind: input, shape index: {}]   ;;  %s708_s1 = inlined_call_operand.vmem [shape: f32[32,4], index: 1, kind: input, shape index: {}]   ;;  %s709_s2 = inlined_call_operand.vmem [shape: f32[4,32], index: 2, kind: input, shape index: {}]   ;;  %s710_s3 = inlined_call_operand.vmem [shape: f32[4,32], index: 3, kind: input, shape index: {}]   ;;  %s711_s4 = inlined_call_operand.vmem [shape: f32[1,4], index: 4, kind: input, shape index: {}]   ;;  %s712_s5 = inlined_call_operand.hbm [shape: f32[1,2,32], index: 5, kind: output, shape index: {}]  }
   0x1   :  { %11 = vsyncpa [#allocation6], 0  ;;  %s611_s18 = smov [#allocation4]  }
   0x2   :  { %s17_s19 = sshll.u32 %s611_s18, 4  ;;  %s18_s19 = int_to_ptr.vmem [resolvable:$true] %s17_s19 }
   0x3   :  { %s575_s20 = scalar_lea.vmem %s18_s19, 2048  ;;  %p580_p1 = scmp.lt.s32.totalorder %s18_s19, %s18_s19 }
   0x4   :  { %p576_p0 = scmp.ne.s32.totalorder %s18_s19, %s575_s20  ;;  %p581_p2 = scmp.lt.s32.totalorder %s575_s20, %s575_s20 }
   0x6   :  { %p582_p3 = por %p581_p2, %p580_p1 }
   0x8   :  { %p583_p4 = pnand %p582_p3, %p576_p0 }
   0xa   :  { %586 = shalt.err (!%p583_p4)
}
   0xb   :  { %s612_s21 = smov 256   ;;  %s613_s22 = smov 16  }
   0xc   :  { %23 = dma.hbm_to_vmem [thread:$0]  %s707_s0, 2048, %s18_s19, [#allocation5], %s612_s21, %s612_s21, %s613_s22  }
   0xd   :  { %607 = dma.done.wait [#allocation5], 2048  }
   0xe   :  { %608 = vsyncadd [#allocation5], 4294965248  ;;  %v50_v0 = vld [vmem:[#allocation4 + $0x40] sm:$0xff]  ;;  %v51_v1 = vld [vmem:[#allocation4 + $0x48] sm:$0xff]  ;;  %vm39_vm0 = vcmask 254976   ;;  %v614_v32 = vmov 0.0   ;;  %v99_v43 = vlaneseq }
   0xf   :  { %v42_v2 = vld [vmem:[#allocation4] sm:$0xff]  ;;  %v71_v3 = vadd.f32 %v51_v1, %v50_v0  ;;  %v43_v4 = vld [vmem:[#allocation4 + $0x8] sm:$0xff]  ;;  %v52_v5 = vld [vmem:[#allocation4 + $0x50] sm:$0xff]  ;;  %v164_v15 = vmax.f32 %v50_v0, %v51_v1  ;;  %40 = vst.msk [vmem:[#allocation2] sm:$0x3] %vm39_vm0, %v614_v32  ;;  %531 = vmatprep.subr.mxu0 %v614_v32  ;;  %542 = vmatprep.subr.mxu1 %v614_v32  ;;  %v615_v33 = vmov -inf  }
  0x10   :  { %v53_v6 = vld [vmem:[#allocation4 + $0x58] sm:$0xff]  ;;  %v59_v7 = vadd.f32 %v43_v4, %v42_v2  ;;  %v44_v8 = vld [vmem:[#allocation4 + $0x10] sm:$0xff]  ;;  %v152_v13 = vmax.f32 %v42_v2, %v43_v4  ;;  %v54_v16 = vld [vmem:[#allocation4 + $0x60] sm:$0xff]  ;;  %41 = vst.msk [vmem:[#allocation3] sm:$0x3] %vm39_vm0, %v615_v33  ;;  %vm616_vm1 = vmmov 0  }
  0x11   :  { %v45_v9 = vld [vmem:[#allocation4 + $0x18] sm:$0xff]  ;;  %72 = vadd.xlane.f32.xlu1 %v71_v3  ;;  %v74_v10 = vadd.f32 %v53_v6, %v52_v5  ;;  %v167_v14 = vmax.f32 %v52_v5, %v53_v6  ;;  %v55_v17 = vld [vmem:[#allocation4 + $0x68] sm:$0xff]  ;;  %v46_v18 = vld [vmem:[#allocation4 + $0x20] sm:$0xff]  ;;  %539 = vmatprep.mubr.msk.f32.mxu0 %vm616_vm1, %v614_v32  ;;  %v100_v46 = vand.u32 127, %v99_v43  ;;  %v102_v48 = vshrl.u32 %v99_v43, 7 }
  0x12   :  { %60 = vadd.xlane.f32.xlu0 %v59_v7  ;;  %v62_v11 = vadd.f32 %v45_v9, %v44_v8  ;;  %v155_v12 = vmax.f32 %v44_v8, %v45_v9  ;;  %v47_v19 = vld [vmem:[#allocation4 + $0x28] sm:$0xff]  ;;  %v77_v20 = vadd.f32 %v55_v17, %v54_v16  ;;  %v170_v22 = vmax.f32 %v54_v16, %v55_v17  ;;  %v56_v24 = vld [vmem:[#allocation4 + $0x70] sm:$0xff]  ;;  %v57_v25 = vld [vmem:[#allocation4 + $0x78] sm:$0xff] }
  0x13   :  { %v65_v21 = vadd.f32 %v47_v19, %v46_v18  ;;  %v158_v23 = vmax.f32 %v46_v18, %v47_v19  ;;  %v48_v26 = vld [vmem:[#allocation4 + $0x30] sm:$0xff]  ;;  %v49_v27 = vld [vmem:[#allocation4 + $0x38] sm:$0xff]  ;;  %v80_v28 = vadd.f32 %v57_v25, %v56_v24  ;;  %v173_v30 = vmax.f32 %v56_v24, %v57_v25  ;;  %v237_v36 = vld [vmem:[%s708_s1 + $0x8] sm:$0xff]  ;;  %544 = vmatprep.mubr.msk.f32.mxu1 %vm616_vm1, %v614_v32 }
  0x14   :  { %v68_v29 = vadd.f32 %v49_v27, %v48_v26  ;;  %v161_v31 = vmax.f32 %v48_v26, %v49_v27  ;;  %v239_v34 = vld [vmem:[%s708_s1 + $0x18] sm:$0xff]  ;;  %v238_v35 = vld [vmem:[%s708_s1 + $0x10] sm:$0xff]  ;;  %v236_v37 = vld [vmem:[%s708_s1] sm:$0xff]  ;;  %v105_v49 = vadd.s32 4294967288, %v100_v46  ;;  %v112_v50 = vadd.s32 4294967280, %v100_v46 }
  0x15   :  { %75 = vadd.xlane.f32.xlu1 %v74_v10  ;;  %532 = vmatpush3.msra.mxu0 %v239_v34  ;;  %v103_v53 = vsub.s32 %v100_v46, %v102_v48  ;;  %v119_v57 = vadd.s32 4294967272, %v100_v46  ;;  %vm110_vm2 = vcmask 130112   ;;  %vm117_vm3 = vcmask 195712  }
  0x16   :  { %63 = vadd.xlane.f32.xlu0 %v62_v11  ;;  %533 = vmatprep.subr.mxu0 %v614_v32  ;;  %v108_v54 = vsub.s32 %v105_v49, %v102_v48  ;;  %v115_v56 = vsub.s32 %v112_v50, %v102_v48  ;;  %vm124_vm4 = vcmask 261312   ;;  %vm145_vm5 = vcmask 1041409   ;;  %v58_v27 = vld [vmem:[#allocation2] sm:$0x3] }
  0x17   :  { %534 = vmatpush3.msra.mxu0 %v238_v35  ;;  %v122_v2 = vsub.s32 %v119_v57, %v102_v48  ;;  %vm234_vm6 = vcmask 1041408   ;;  %vm240_vm7 = vcmask 261120   ;;  %vm329_vm8 = vcmask 1043456   ;;  %v515_v48 = vld [vmem:[%s711_s4] ss:$0 sm:$0xff] }
  0x18   :  { %535 = vmatprep.subr.mxu0 %v614_v32  ;;  %vm325_vm10 = vcmask 31744  }
  0x19   :  { %156 = vmax.xlane.f32.xlu1 %v155_v12  ;;  %536 = vmatpush3.msra.mxu0 %v237_v36 }
  0x1a   :  { %153 = vmax.xlane.f32.xlu0 %v152_v13  ;;  %537 = vmatprep.subr.mxu0 %v614_v32 }
  0x1b   :  { %538 = vmatpush3.msra.mxu0 %v236_v37 }
  0x1d   :  { %168 = vmax.xlane.f32.xlu1 %v167_v14 }
  0x1e   :  { %165 = vmax.xlane.f32.xlu0 %v164_v15 }
  0x21   :  { %78 = vadd.xlane.f32.xlu1 %v77_v20 }
  0x22   :  { %66 = vadd.xlane.f32.xlu0 %v65_v21 }
  0x25   :  { %171 = vmax.xlane.f32.xlu1 %v170_v22 }
  0x26   :  { %159 = vmax.xlane.f32.xlu0 %v158_v23 }
  0x29   :  { %81 = vadd.xlane.f32.xlu1 %v80_v28 }
  0x2a   :  { %69 = vadd.xlane.f32.xlu0 %v68_v29 }
  0x2d   :  { %174 = vmax.xlane.f32.xlu1 %v173_v30 }
  0x2e   :  { %162 = vmax.xlane.f32.xlu0 %v161_v31 }
  0x9a   :  { %v73_v38 = vpop.xlane.xlu1 %72 }
  0x9b   :  { %v61_v39 = vpop.xlane.xlu0 %60  ;;  %v87_v58 = vmul.f32 0.00390625, %v73_v38  ;;  %v151_v38 = vld [vmem:[#allocation3] sm:$0x3] }
  0x9c   :  { %v83_v59 = vmul.f32 0.00390625, %v61_v39 }
  0x9d   :  { %v129_v3 = vrot.slane %v87_v58, %v103_v53 }
  0x9e   :  { %v76_v40 = vpop.xlane.xlu1 %75  ;;  %v104_v4 = vrot.slane %v83_v59, %v103_v53 }
  0x9f   :  { %v64_v41 = vpop.xlane.xlu0 %63  ;;  %v88_v55 = vmul.f32 0.00390625, %v76_v40 }
  0xa0   :  { %v84_v60 = vmul.f32 0.00390625, %v64_v41 }
  0xa1   :  { %v133_v1 = vrot.slane %v88_v55, %v108_v54 }
  0xa2   :  { %v157_v42 = vpop.xlane.xlu1 %156  ;;  %v109_v5 = vrot.slane %v84_v60, %v108_v54 }
  0xa3   :  { %v154_v44 = vpop.xlane.xlu0 %153  ;;  %v191_v13 = vrot.slane %v157_v42, %v108_v54  ;;  %v134_v17 = vsel %vm110_vm2, %v133_v1, %v129_v3 }
  0xa4   :  { %v187_v14 = vrot.slane %v154_v44, %v103_v53  ;;  %v111_v20 = vsel %vm110_vm2, %v109_v5, %v104_v4 }
  0xa6   :  { %v169_v45 = vpop.xlane.xlu1 %168  ;;  %v192_v30 = vsel %vm110_vm2, %v191_v13, %v187_v14 }
  0xa7   :  { %v166_v47 = vpop.xlane.xlu0 %165  ;;  %v210_v8 = vrot.slane %v169_v45, %v108_v54 }
  0xa8   :  { %v206_v9 = vrot.slane %v166_v47, %v103_v53  ;;  %v324_v47 = vld [vmem:[%s709_s2] sm:$0xf]  ;;  %s617_s2 = smov [#allocation7]  }
  0xa9   :  { %543 = vmatpush3.msk.msra.mxu1 %vm329_vm8, %v324_v47 }
  0xaa   :  { %v79_v51 = vpop.xlane.xlu1 %78  ;;  %v211_v24 = vsel %vm110_vm2, %v210_v8, %v206_v9  ;;  %547 = vmatprep.subr.mxu1 %v614_v32 }
  0xab   :  { %v67_v52 = vpop.xlane.xlu0 %66  ;;  %v89_v61 = vmul.f32 0.00390625, %v79_v51 }
  0xac   :  { %v85_v63 = vmul.f32 0.00390625, %v67_v52  ;;  %v409_v52 = vld [vmem:[%s710_s3] sm:$0xf]  ;;  %s505_s3 = sshll.u32 %s617_s2, 4  ;;  %s506_s3 = int_to_ptr.vmem [resolvable:$true] %s505_s3 }
  0xad   :  { %v138_v6 = vrot.slane %v89_v61, %v115_v56  ;;  %s587_s4 = scalar_lea.vmem %s506_s3, 32  ;;  %p592_p6 = scmp.lt.s32.totalorder %s506_s3, %s506_s3 }
  0xae   :  { %v172_v62 = vpop.xlane.xlu1 %171  ;;  %v116_v10 = vrot.slane %v85_v63, %v115_v56  ;;  %p588_p5 = scmp.ne.s32.totalorder %s506_s3, %s587_s4  ;;  %p593_p7 = scmp.lt.s32.totalorder %s587_s4, %s587_s4 }
  0xaf   :  { %v160_v0 = vpop.xlane.xlu0 %159  ;;  %v215_v15 = vrot.slane %v172_v62, %v115_v56  ;;  %v139_v21 = vsel %vm117_vm3, %v138_v6, %v134_v17 }
  0xb0   :  { %v196_v18 = vrot.slane %v160_v0, %v115_v56  ;;  %v118_v25 = vsel %vm117_vm3, %v116_v10, %v111_v20  ;;  %p594_p8 = por %p593_p7, %p592_p6 }
  0xb1   :  { %v216_v31 = vsel %vm117_vm3, %v215_v15, %v211_v24 }
  0xb2   :  { %v82_v7 = vpop.xlane.xlu1 %81  ;;  %v197_v35 = vsel %vm117_vm3, %v196_v18, %v192_v30  ;;  %p595_p9 = pnand %p594_p8, %p588_p5 }
  0xb3   :  { %v90_v11 = vmul.f32 0.00390625, %v82_v7  ;;  %v70_v12 = vpop.xlane.xlu0 %69 }
  0xb4   :  { %v86_v16 = vmul.f32 0.00390625, %v70_v12 }
  0xb5   :  { %v143_v19 = vrot.slane %v90_v11, %v122_v2 }
  0xb6   :  { %v123_v22 = vrot.slane %v86_v16, %v122_v2  ;;  %v175_v23 = vpop.xlane.xlu1 %174 }
  0xb7   :  { %v144_v26 = vsel %vm124_vm4, %v143_v19, %v139_v21  ;;  %v220_v28 = vrot.slane %v175_v23, %v122_v2  ;;  %v163_v29 = vpop.xlane.xlu0 %162 }
  0xb8   :  { %v125_v33 = vsel %vm124_vm4, %v123_v22, %v118_v25  ;;  %v201_v34 = vrot.slane %v163_v29, %v122_v2 }
  0xb9   :  { %v146_v36 = vsel %vm145_vm5, %v144_v26, %v125_v33  ;;  %v221_v37 = vsel %vm124_vm4, %v220_v28, %v216_v31 }
  0xba   :  { %v148_v39 = vadd.f32 %v146_v36, %v58_v27  ;;  %v202_v40 = vsel %vm124_vm4, %v201_v34, %v197_v35 }
  0xbb   :  { %v222_v41 = vsel %vm145_vm5, %v221_v37, %v202_v40 }
  0xbc   :  { %150 = vst.msk [vmem:[#allocation2] sm:$0x3] %vm39_vm0, %v148_v39  ;;  %v224_v42 = vmax.f32 %v151_v38, %v222_v41 }
  0xbe   :  { %225 = vst.msk [vmem:[#allocation3] sm:$0x3] %vm39_vm0, %v224_v42 }
  0xc3   :  { %v229_v45 = vld [vmem:[#allocation2] sm:$0x3] }
  0xc5   :  { %v230_v43 = vld [vmem:[#allocation3] sm:$0x3] }
  0xc6   :  { %v232_v44 = vrot.slane %v230_v43, 6 }
  0xc8   :  { %v235_v46 = vsel %vm234_vm6, %v229_v45, %v232_v44 }
  0xc9   :  { %540 = vmatmul.mubr.msk.f32.vlgmr.msra.gmra.mxu0 %vm240_vm7, %v235_v46 }
 0x189   :  { %v310_v49 = vpop.f32.mrf.mxu0 }
 0x18a   :  { %vm314_vm9 = vcmp.ge.f32.partialorder %v310_v49, 0.0  ;;  %v322_v50 = vmul.f32 %v515_v48, %v310_v49 }
 0x18b   :  { %v541_v51 = vpop.f32.mrf.mxu0 }
 0x18c   :  { %v323_v53 = vsel %vm314_vm9, %v310_v49, %v322_v50 }
 0x18d   :  { %545 = vmatmul.mubr.msk.f32.vlgmr.msra.gmra.mxu1 %vm325_vm10, %v323_v53 }
 0x18e   :  { %548 = vmatpush3.msk.msra.mxu1 %vm329_vm8, %v409_v52  ;;  %549 = vmatprep.mubr.msk.f32.mxu1 %vm616_vm1, %v614_v32 }
 0x191   :  { %550 = vmatmul.mubr.msk.f32.vlgmr.msra.gmra.mxu1 %vm325_vm10, %v323_v53 }
 0x24d   :  { %v399_v54 = vpop.f32.mrf.mxu1 }
 0x24e   :  { %v518_v55 = vmul.f32 -1.442695, %v399_v54 }
 0x24f   :  { %v546_v56 = vpop.f32.mrf.mxu1 }
 0x250   :  { %559 = vpow2.f32 %v518_v55 }
 0x251   :  { %v479_v57 = vpop.f32.mrf.mxu1 }
 0x252   :  { %v489_v1 = vrot.slane %v479_v57, 2 }
 0x253   :  { %v551_v58 = vpop.f32.mrf.mxu1 }
 0x25d   :  { %v560_v59 = vpop.eup %559 }
 0x25e   :  { %v406_v60 = vadd.f32 1.0, %v560_v59 }
 0x260   :  { %561 = vrcp.f32 %v406_v60 }
 0x26d   :  { %v562_v61 = vpop.eup %561 }
 0x26e   :  { %v484_v62 = vrot.slane %v562_v61, 2 }
 0x270   :  { %v486_v63 = vadd.f32 %v562_v61, %v484_v62 }
 0x272   :  { %v487_v0 = vadd.f32 %v486_v63, %v479_v57 }
 0x274   :  { %v491_v2 = vadd.f32 %v489_v1, %v487_v0 }
 0x276   :  { %v521_v3 = vmul.f32 -1.442695, %v491_v2 }
 0x278   :  { %563 = vpow2.f32 %v521_v3 }
 0x285   :  { %v564_v4 = vpop.eup %563 }
 0x286   :  { %v495_v32 = vadd.f32 1.0, %v564_v4 }
 0x288   :  { %565 = vrcp.f32 %v495_v32 }
 0x295   :  { %v566_v5 = vpop.eup %565 }
 0x296   :  { %498 = vst.msk [vmem:[#allocation7] sm:$0x3] %vm39_vm0, %v566_v5 }
 0x297   :  { %598 = shalt.err (!%p595_p9)
}
 0x298   :  { %508 = dma.vmem_to_hbm [thread:$0]  %s506_s3, 32, %s712_s5, [#allocation6]  }
 0x299   :  { %609 = dma.done.wait [#allocation6], 32  }
 0x29a   :  { %610 = vsyncadd [#allocation6], 4294967264 }
 0x29b   :  { %512 = vsyncpa [#allocation5], 1 }
 0x29c   :  { %513 = vsyncpa [#allocation6], 1 }

</bundles_post_ra>
